<compile_context>
chip_gen: v7x
topology: tpu7x:2x2x1
jax: 0.10.0
libtpu: 0.0.40
codegen_flags: <defaults>
</compile_context>

<pallas_src>
import math

import jax
import jax.numpy as jnp
from jax.experimental import pallas as pl
from jax.experimental.pallas import tpu as pltpu

IN_F = 16          # input features per sample
WIDTH = 64         # hidden width
OUT_F = 4          # logits per sample
NEG_SLOPE = 0.2    # LeakyReLU slope

# 8 samples per 128-lane row (optimal for the 128-lane MXU push granularity).
GROUPS = 8
X_LANES = GROUPS * IN_F      # 128
H_LANES = GROUPS * WIDTH     # 512
O_LANES = GROUPS * OUT_F     # 32

# Below this many samples a single plain-XLA matmul beats the pallas_call
# launch + BlockSpec DMA setup (work is only ~2.5 KFLOP per row).
_SMALL_BATCH = 512

# Max packed-row tile.  Real VMEM at bm=1024 (everything lane-dense):
#   x tile : 1024*128*4 B = 512 KiB   (x2 double-buffered)
#   out    : 1024* 32*4 B = 128 KiB   (x2)
#   hidden : 1024*512*4 B =   2 MiB f32 (+1 MiB bf16 copy) internal scratch
#   weights/biases: < 0.3 MiB, grid-invariant (VMEM-resident)
# ~4.5 MiB total -- comfortably inside the default scoped VMEM on
# v5e (16 MiB), v6e (32 MiB) and v7x (32 MiB scoped of 64 MiB physical).
_MAX_BM_PACKED = 1024


def _mlp_kernel(x_ref, w1_ref, b1_ref, w2_ref, b2_ref, o_ref):
    """hidden = LeakyReLU(x @ W1_blk + b1); out = hidden @ W2_blk + b2.

    8 samples per row; both matmuls are block-diagonal so samples never mix.
    MXU inputs in compute dtype (bf16 by default), accumulation + elementwise
    math in f32.
    """
    x = x_ref[...].astype(w1_ref.dtype)
    h = jnp.dot(x, w1_ref[...], preferred_element_type=jnp.float32)
    h = h + b1_ref[...]                       # f32 bias add
    h = jnp.maximum(h, NEG_SLOPE * h)         # LeakyReLU(0.2): one VALU op
    o = jnp.dot(h.astype(w2_ref.dtype), w2_ref[...],
                preferred_element_type=jnp.float32)
    o_ref[...] = o + b2_ref[...]


def _num_tensorcores():
    """Best-effort TensorCores-per-chip count (perf heuristic only)."""
    try:
        info = pltpu.get_tpu_info()
        for attr in ("num_cores", "core_count", "num_tensorcores",
                     "tensorcore_count"):
            v = getattr(info, attr, None)
            if isinstance(v, int) and v > 0:
                return v
    except Exception:
        pass
    try:
        kind = jax.devices()[0].device_kind.lower()
    except Exception:
        kind = ""
    # known single-TC chips: v5e ("v5 lite"), v6e ("v6 lite")
    if "lite" in kind or "v5e" in kind or "v6" in kind:
        return 1
    # v4 / v5p / v7x megacore; unknown chips default here (extra grid steps
    # on a single-TC chip are nearly free, the reverse mistake is not).
    return 2


def _choose_bm(n_packed):
    """Packed-row tile size.

    As large as the VMEM budget allows (amortizes ~0.35 us/grid-step), but on
    dual-TC chips keep >= 2 steps per core so dimension_semantics=("parallel",)
    load-balances and each core still overlaps DMA with compute.  On
    single-TC chips (v5e/v6e) a 1-step grid is allowed for mid-size n.
    """
    ncores = _num_tensorcores()
    min_steps = 2 * ncores if ncores > 1 else 1
    bm = min(_MAX_BM_PACKED, pl.cdiv(n_packed, min_steps))
    return max(8, ((bm + 7) // 8) * 8)   # sublane multiple of 8


def _pack_params(params, compute_dtype):
    """Build the 8-group block-diagonal weights / tiled biases."""
    w1 = jnp.asarray(params["w1"], jnp.float32)              # [16, 64]
    w2 = jnp.asarray(params["w2"], jnp.float32)              # [64, 4]
    b1 = jnp.asarray(params["b1"], jnp.float32).reshape(1, WIDTH)
    b2 = jnp.asarray(params["b2"], jnp.float32).reshape(1, OUT_F)
    eye = jnp.eye(GROUPS, dtype=jnp.float32)
    w1_blk = jnp.kron(eye, w1).astype(compute_dtype)          # [128, 512]
    w2_blk = jnp.kron(eye, w2).astype(compute_dtype)          # [512, 32]
    b1_blk = jnp.tile(b1, (1, GROUPS))                        # [1, 512] f32
    b2_blk = jnp.tile(b2, (1, GROUPS))                        # [1, 32]  f32
    return w1_blk, b1_blk, w2_blk, b2_blk


def net_model_forward(x, params, *, bm=None, compute_dtype=jnp.bfloat16,
                      force_kernel=False):
    """Pallas implementation of NetModel.forward.

    x: any shape whose total size is a multiple of 16 (flattened to (-1, 16)).
    params: dict with 'w1' [16,64], 'b1' [1,64], 'w2' [64,4], 'b2' [1,4].
    """
    x2 = jnp.reshape(x, (-1, IN_F)).astype(jnp.float32)
    n = x2.shape[0]

    # Tiny batches: the pallas_call launch costs more than the work.
    if n <= _SMALL_BATCH and not force_kernel:
        w1 = jnp.asarray(params["w1"], jnp.float32)
        w2 = jnp.asarray(params["w2"], jnp.float32)
        h = x2 @ w1 + jnp.asarray(params["b1"], jnp.float32)
        h = jnp.maximum(h, NEG_SLOPE * h)
        return h @ w2 + jnp.asarray(params["b2"], jnp.float32)

    # Pack 8 samples per 128-lane row (row-major reshape: free).  Only pad
    # when N is not a multiple of 8 (at most 7 zero rows).
    n_pad = ((n + GROUPS - 1) // GROUPS) * GROUPS
    if n_pad != n:
        x2 = jnp.pad(x2, ((0, n_pad - n), (0, 0)))
    n_p = n_pad // GROUPS
    xp = x2.reshape(n_p, X_LANES)

    w1_blk, b1_blk, w2_blk, b2_blk = _pack_params(params, compute_dtype)

    if bm is None:
        bm = _choose_bm(n_p)

    # Ragged packed-row grid: Pallas masks the boundary block on writeback;
    # rows are independent, so the padded tail never contaminates valid rows.
    grid = (pl.cdiv(n_p, bm),)

    out_p = pl.pallas_call(
        _mlp_kernel,
        out_shape=jax.ShapeDtypeStruct((n_p, O_LANES), jnp.float32),
        grid_spec=pltpu.PrefetchScalarGridSpec(
            num_scalar_prefetch=0,
            grid=grid,
            in_specs=[
                pl.BlockSpec((bm, X_LANES), lambda i: (i, 0)),       # x (streamed, lane-dense)
                pl.BlockSpec((X_LANES, H_LANES), lambda i: (0, 0)),  # W1_blk (VMEM-resident)
                pl.BlockSpec((1, H_LANES), lambda i: (0, 0)),        # b1_blk
                pl.BlockSpec((H_LANES, O_LANES), lambda i: (0, 0)),  # W2_blk
                pl.BlockSpec((1, O_LANES), lambda i: (0, 0)),        # b2_blk
            ],
            out_specs=pl.BlockSpec((bm, O_LANES), lambda i: (i, 0)),
        ),
        compiler_params=pltpu.CompilerParams(
            dimension_semantics=("parallel",)),
    )(xp, w1_blk, b1_blk, w2_blk, b2_blk)

    out = out_p.reshape(n_pad, OUT_F)
    if n_pad != n:
        out = out[:n]
    return out


def net_model_get_prob(x, params, **kw):
    """Pallas-backed equivalent of NetModel.get_prob."""
    # TODO(synk): fuse the per-row softmax into the kernel epilogue; with the
    # 8-sample packed output it needs a 4-lane segmented reduce (XLU rolls),
    # which was not worth the complexity for a [N,4] epilogue here.
    logits = net_model_forward(x, params, **kw)
    prob = jax.nn.softmax(logits, axis=-1).reshape(-1)
    prob = prob.astype(jnp.float64)  # no-op on TPU unless jax_enable_x64 is set
    return prob / prob.sum()


def init_params(key):
    """Deterministic xavier_normal weights, zero biases (matches __init__)."""
    k1, k2 = jax.random.split(key)
    std1 = math.sqrt(2.0 / (IN_F + WIDTH))
    std2 = math.sqrt(2.0 / (WIDTH + OUT_F))
    # PyTorch Linear weight is [out, in]; we store the transpose [in, out].
    w1 = (jax.random.normal(k1, (WIDTH, IN_F), jnp.float32) * std1).T
    w2 = (jax.random.normal(k2, (OUT_F, WIDTH), jnp.float32) * std2).T
    b1 = jnp.zeros((1, WIDTH), jnp.float32)
    b2 = jnp.zeros((1, OUT_F), jnp.float32)
    return {"w1": w1, "b1": b1, "w2": w2, "b2": b2}


def _reference_forward(x, params):
    x2 = jnp.reshape(x, (-1, IN_F)).astype(jnp.float32)
    h = x2 @ params["w1"] + params["b1"]
    h = jnp.where(h > 0, h, NEG_SLOPE * h)
    return h @ params["w2"] + params["b2"]


if __name__ == "__main__":
    key = jax.random.PRNGKey(0)
    pkey, xkey, rkey, skey, bkey = jax.random.split(key, 5)
    params = init_params(pkey)

    # Main spec-shaped input: (2, 4, 16, 16) -> view(-1, 16) -> 128 samples.
    # force_kernel=True so the canonical small shape exercises the Pallas path
    # (the production heuristic routes n <= 512 to the plain-XLA fallback).
    x = jax.random.normal(xkey, (2, 4, 16, 16), jnp.float32)
    ref = _reference_forward(x, params)

    out_bf16 = jax.block_until_ready(net_model_forward(x, params, force_kernel=True))
    assert out_bf16.shape == (128, OUT_F), out_bf16.shape
    assert jnp.allclose(out_bf16, ref, atol=3e-2, rtol=3e-2), "mismatch (bf16 kernel)"

    # f32 compute path: validates the block-diagonal packing at tight tolerance.
    out_f32 = jax.block_until_ready(
        net_model_forward(x, params, force_kernel=True, compute_dtype=jnp.float32))
    assert jnp.allclose(out_f32, ref, atol=2e-3, rtol=2e-3), "mismatch (f32 kernel)"

    # Larger batch: kernel path via the normal heuristic; 1000 samples ->
    # 125 packed rows, ragged against the chosen bm (masked boundary block).
    x_big = jax.random.normal(bkey, (1000, 16), jnp.float32)
    out_big = jax.block_until_ready(net_model_forward(x_big, params))
    ref_big = _reference_forward(x_big, params)
    assert out_big.shape == (1000, OUT_F), out_big.shape
    assert jnp.allclose(out_big, ref_big, atol=3e-2, rtol=3e-2), "mismatch (big)"

    # Sample count not a multiple of 8: exercises the pad-to-8 path.
    x_rag = jax.random.normal(rkey, (813, 16), jnp.float32)
    out_rag = jax.block_until_ready(net_model_forward(x_rag, params, force_kernel=True))
    ref_rag = _reference_forward(x_rag, params)
    assert out_rag.shape == (813, OUT_F), out_rag.shape
    assert jnp.allclose(out_rag, ref_rag, atol=3e-2, rtol=3e-2), "mismatch (ragged)"

    # Tiny batch: (2, 4, 16) -> 8 samples, small-batch fallback path (exact f32).
    x_small = jax.random.normal(skey, (2, 4, 16), jnp.float32)
    out_small = jax.block_until_ready(net_model_forward(x_small, params))
    ref_small = _reference_forward(x_small, params)
    assert out_small.shape == (8, OUT_F), out_small.shape
    assert jnp.allclose(out_small, ref_small, atol=1e-5, rtol=1e-5), "mismatch (small)"

    # get_prob glue on the kernel path.
    prob = jax.block_until_ready(net_model_get_prob(x, params, force_kernel=True))
    assert prob.shape == (128 * OUT_F,), prob.shape
    assert jnp.allclose(prob.sum(), 1.0, atol=1e-5)

    print("KERNEL_OK")
</pallas_src>

<mosaic_0001>
module attributes {stable_mosaic.version = 11 : i64} {
  func.func @_mlp_kernel(%arg0: i32, %arg1: memref<8x128xf32, #tpu.memory_space<vmem>>, %arg2: memref<128x512xbf16, #tpu.memory_space<vmem>>, %arg3: memref<1x512xf32, #tpu.memory_space<vmem>>, %arg4: memref<512x32xbf16, #tpu.memory_space<vmem>>, %arg5: memref<1x32xf32, #tpu.memory_space<vmem>>, %arg6: memref<8x32xf32, #tpu.memory_space<vmem>>) attributes {dimension_semantics = [#tpu.dimension_semantics<parallel>], iteration_bounds = array<i64: 2>, scalar_prefetch = 0 : i64, scratch_operands = 0 : i64, tpu.core_type = #tpu.core_type<tc>, window_params = [{transform_indices = @transform_0, window_bounds = array<i64: 8, 128>}, {pipeline_mode = #tpu.pipeline_mode<synchronous>, transform_indices = @transform_1, window_bounds = array<i64: 128, 512>}, {pipeline_mode = #tpu.pipeline_mode<synchronous>, transform_indices = @transform_2, window_bounds = array<i64: 1, 512>}, {pipeline_mode = #tpu.pipeline_mode<synchronous>, transform_indices = @transform_3, window_bounds = array<i64: 512, 32>}, {pipeline_mode = #tpu.pipeline_mode<synchronous>, transform_indices = @transform_4, window_bounds = array<i64: 1, 32>}, {transform_indices = @transform_5, window_bounds = array<i64: 8, 32>}]} {
    %c0 = arith.constant 0 : index
    %c0_0 = arith.constant 0 : index
    %0 = vector.load %arg1[%c0, %c0_0] : memref<8x128xf32, #tpu.memory_space<vmem>>, vector<8x128xf32>
    %1 = arith.truncf %0 : vector<8x128xf32> to vector<8x128xbf16>
    %c0_1 = arith.constant 0 : index
    %c0_2 = arith.constant 0 : index
    %2 = vector.load %arg2[%c0_1, %c0_2] : memref<128x512xbf16, #tpu.memory_space<vmem>>, vector<128x512xbf16>
    %cst = arith.constant dense<0.000000e+00> : vector<8x512xf32>
    %3 = tpu.matmul %1, %2, %cst {dimension_numbers = #tpu.dot_dimension_numbers<[1], [0], [0], [1], [0, 0, 1, 1], [], []>} : vector<8x128xbf16>, vector<128x512xbf16>, vector<8x512xf32> -> vector<8x512xf32>
    %c0_3 = arith.constant 0 : index
    %c0_4 = arith.constant 0 : index
    %4 = vector.load %arg3[%c0_3, %c0_4] : memref<1x512xf32, #tpu.memory_space<vmem>>, vector<1x512xf32>
    %5 = vector.broadcast %4 : vector<1x512xf32> to vector<8x512xf32>
    %6 = arith.addf %3, %5 : vector<8x512xf32>
    %cst_5 = arith.constant 2.000000e-01 : f32
    %7 = vector.broadcast %cst_5 : f32 to vector<8x512xf32>
    %8 = arith.mulf %7, %6 : vector<8x512xf32>
    %9 = arith.maximumf %6, %8 : vector<8x512xf32>
    %10 = arith.truncf %9 : vector<8x512xf32> to vector<8x512xbf16>
    %c0_6 = arith.constant 0 : index
    %c0_7 = arith.constant 0 : index
    %11 = vector.load %arg4[%c0_6, %c0_7] : memref<512x32xbf16, #tpu.memory_space<vmem>>, vector<512x32xbf16>
    %cst_8 = arith.constant dense<0.000000e+00> : vector<8x32xf32>
    %12 = tpu.matmul %10, %11, %cst_8 {dimension_numbers = #tpu.dot_dimension_numbers<[1], [0], [0], [1], [0, 0, 1, 1], [], []>} : vector<8x512xbf16>, vector<512x32xbf16>, vector<8x32xf32> -> vector<8x32xf32>
    %c0_9 = arith.constant 0 : index
    %c0_10 = arith.constant 0 : index
    %13 = vector.load %arg5[%c0_9, %c0_10] : memref<1x32xf32, #tpu.memory_space<vmem>>, vector<1x32xf32>
    %14 = vector.broadcast %13 : vector<1x32xf32> to vector<8x32xf32>
    %15 = arith.addf %12, %14 : vector<8x32xf32>
    %c0_11 = arith.constant 0 : index
    %c0_12 = arith.constant 0 : index
    %16 = vector.load %arg6[%c0_11, %c0_12] : memref<8x32xf32, #tpu.memory_space<vmem>>, vector<8x32xf32>
    tpu.vector_store %arg6[%c0_11, %c0_12], %15 {strides = array<i32>} : memref<8x32xf32, #tpu.memory_space<vmem>>, vector<8x32xf32>,
    return
  }
  func.func @transform_0(%arg0: i32) -> (i32, i32) {
    %c0_i32 = arith.constant 0 : i32
    %c0_i32_0 = arith.constant 0 : i32
    return %arg0, %c0_i32 : i32, i32
  }
  func.func @transform_1(%arg0: i32) -> (i32, i32) {
    %c0_i32 = arith.constant 0 : i32
    %c0_i32_0 = arith.constant 0 : i32
    %c0_i32_1 = arith.constant 0 : i32
    return %c0_i32, %c0_i32_0 : i32, i32
  }
  func.func @transform_2(%arg0: i32) -> (i32, i32) {
    %c0_i32 = arith.constant 0 : i32
    %c0_i32_0 = arith.constant 0 : i32
    %c0_i32_1 = arith.constant 0 : i32
    return %c0_i32, %c0_i32_0 : i32, i32
  }
  func.func @transform_3(%arg0: i32) -> (i32, i32) {
    %c0_i32 = arith.constant 0 : i32
    %c0_i32_0 = arith.constant 0 : i32
    %c0_i32_1 = arith.constant 0 : i32
    return %c0_i32, %c0_i32_0 : i32, i32
  }
  func.func @transform_4(%arg0: i32) -> (i32, i32) {
    %c0_i32 = arith.constant 0 : i32
    %c0_i32_0 = arith.constant 0 : i32
    %c0_i32_1 = arith.constant 0 : i32
    return %c0_i32, %c0_i32_0 : i32, i32
  }
  func.func @transform_5(%arg0: i32) -> (i32, i32) {
    %c0_i32 = arith.constant 0 : i32
    %c0_i32_0 = arith.constant 0 : i32
    return %arg0, %c0_i32 : i32, i32
  }
}

</mosaic_0001>

<bundles_post_ra>
// kernel: tpu_custom_call.1
= control target key start
LH: loop header
LB: loop body
LE: loop exit
PB: predicated region body
PF: predicated region fallthrough
CT: control target
= control target key end

     0   :  { %10 = vsyncpa [#allocation3], 0  ;;  %s1582_s0 = inlined_call_operand.vmem [shape: f32[16,128], index: 0, kind: input, shape index: {}]   ;;  %s1583_s1 = inlined_call_operand.vmem [shape: bf16[128,512], index: 1, kind: input, shape index: {}]   ;;  %s1584_s2 = inlined_call_operand.vmem [shape: f32[1,512], index: 2, kind: input, shape index: {}]   ;;  %s1585_s3 = inlined_call_operand.vmem [shape: bf16[512,32], index: 3, kind: input, shape index: {}]   ;;  %s1586_s4 = inlined_call_operand.vmem [shape: f32[1,32], index: 4, kind: input, shape index: {}]   ;;  %s1587_s5 = inlined_call_operand.hbm [shape: f32[16,32], index: 5, kind: output, shape index: {}]  }
   0x1   :  { %12 = vsyncpa [#allocation3 + $0x1], 0  ;;  %s1284_s18 = smov 0   ;;  %s1286_s19 = smov 0  }
   0x2   :  { %s1288_s20 = smov 0   ;;  %s1290_s21 = smov 0  }
   0x3 LB: > { %s1305_s22 = sadd.s32 4294967295, %s1250_s21   ;;  %s949_s23 = sadd.s32 4294967294, %s1250_s21   ;;  %s1250_s21 = sphi %s1290_s21, %s1593_s21   ;;  %s1246_s20 = sphi %s1288_s20, %s1592_s20   ;;  %s1242_s19 = sphi %s1286_s19, %s1591_s19   ;;  %s1238_s18 = sphi %s1284_s18, %s1590_s18  }
   0x4   : > { %s1309_s24 = sadd.s32 1, %s1250_s21   ;;  %s135_s25 = sadd.s32 1, %s1246_s20 }
   0x5   : > { %s132_s26 = ssub.s32 %s1250_s21, %s1309_s24  ;;  %p145_p0 = scmp.ne.s32.totalorder %s1246_s20, %s1242_s19 }
   0x6   : > { %p133_p1 = scmp.eq.s32.totalorder %s132_s26, 0  ;;  %p146_p2 = scmp.eq.s32.totalorder %s1305_s22, 1 }
   0x7   : > { %p151_p3 = scmp.ne.s32.totalorder %s1242_s19, %s1238_s18  ;;  %p152_p4 = scmp.eq.s32.totalorder %s949_s23, 1 }
   0x8   : > { %s1320_s27 = scalar_select %p133_p1, %s1246_s20, %s135_s25  }
   0x9   : > { %p1322_p5 = por %p146_p2, %p145_p0  ;;  %p1326_p6 = por %p152_p4, %p151_p3 }
   0xa   : > { %p952_p7 = scmp.ge.s32.totalorder %s1250_s21, 1  ;;  %p189_p8 = scmp.lt.s32.totalorder %s1250_s21, 3 }
   0xc   : > { %p190_p9 = pnand %p952_p7, %p189_p8 }
   0xd   : > { %v1108_v0 = vld [vmem:[%s1583_s1 + $0x4] ss:$16 sps:$4 sm:$0xff] (!%p190_p9)   ;;  %v1110_v1 = vld [vmem:[%s1583_s1 + $0xc] ss:$16 sps:$4 sm:$0xff] (!%p190_p9)   ;;  %v1252_v2 = vmov (!%p190_p9), 0   ;;  %p216_p10 = scmp.lt.s32.totalorder (!%p190_p9), %s1305_s22, 1 }
   0xe   : > { %193 = sbr.rel (%p190_p9) target bundleno = 502 (0x1f6), region = 40  ;;  %469 = vmatprep.mubr.bf16.mxu0 (!%p190_p9), %v1252_v2  ;;  %510 = vmatprep.mubr.bf16.mxu1 (!%p190_p9), %v1252_v2  ;;  %v1112_v3 = vld [vmem:[%s1583_s1] ss:$16 sps:$4 sm:$0xff] (!%p190_p9)   ;;  %v1113_v4 = vld [vmem:[%s1583_s1 + $0x8] ss:$16 sps:$4 sm:$0xff] (!%p190_p9)   ;;  %s1021_s16 = sshll.u32 (!%p190_p9), %s1305_s22, 7 }
   0xf   : > { %437 = vmatprep.subr.bf16.mxu0 (!%p190_p9), %v1108_v0  ;;  %478 = vmatprep.subr.bf16.mxu1 (!%p190_p9), %v1110_v1  ;;  %v1114_v5 = vld [vmem:[%s1583_s1 + $0x24] ss:$16 sps:$4 sm:$0xff] (!%p190_p9)   ;;  %v1116_v6 = vld [vmem:[%s1583_s1 + $0x2c] ss:$16 sps:$4 sm:$0xff] (!%p190_p9)   ;;  %v1118_v7 = vld [vmem:[%s1583_s1 + $0x20] ss:$16 sps:$4 sm:$0xff] (!%p190_p9)   ;;  %s1540_s30 = scalar_lea.hbm (!%p190_p9), %s1587_s5, %s1021_s16 }
  0x10   : > { %438 = vmatpush1.bf16.msra.mxu0 (!%p190_p9), %v1112_v3  ;;  %479 = vmatpush1.bf16.msra.mxu1 (!%p190_p9), %v1113_v4  ;;  %v1119_v8 = vld [vmem:[%s1583_s1 + $0x28] ss:$16 sps:$4 sm:$0xff] (!%p190_p9)   ;;  %v1120_v9 = vld [vmem:[%s1583_s1 + $0x44] ss:$16 sps:$4 sm:$0xff] (!%p190_p9)   ;;  %v1122_v10 = vld [vmem:[%s1583_s1 + $0x4c] ss:$16 sps:$4 sm:$0xff] (!%p190_p9)   ;;  %v257_v3 = vlaneseq (!%p190_p9) }
  0x11   : > { %439 = vmatprep.subr.bf16.mxu0 (!%p190_p9), %v1114_v5  ;;  %480 = vmatprep.subr.bf16.mxu1 (!%p190_p9), %v1116_v6  ;;  %v1124_v11 = vld [vmem:[%s1583_s1 + $0x40] ss:$16 sps:$4 sm:$0xff] (!%p190_p9)   ;;  %v1125_v12 = vld [vmem:[%s1583_s1 + $0x48] ss:$16 sps:$4 sm:$0xff] (!%p190_p9)   ;;  %v1126_v13 = vld [vmem:[%s1583_s1 + $0x64] ss:$16 sps:$4 sm:$0xff] (!%p190_p9)  }
  0x12   : > { %v1128_v14 = vld [vmem:[%s1583_s1 + $0x6c] ss:$16 sps:$4 sm:$0xff] (!%p190_p9)   ;;  %v1130_v15 = vld [vmem:[%s1583_s1 + $0x60] ss:$16 sps:$4 sm:$0xff] (!%p190_p9)   ;;  %v1131_v16 = vld [vmem:[%s1583_s1 + $0x68] ss:$16 sps:$4 sm:$0xff] (!%p190_p9)  }
  0x13   : > { %v1132_v17 = vld [vmem:[%s1583_s1 + $0x84] ss:$16 sps:$4 sm:$0xff] (!%p190_p9)   ;;  %v1134_v18 = vld [vmem:[%s1583_s1 + $0x8c] ss:$16 sps:$4 sm:$0xff] (!%p190_p9)   ;;  %v1136_v19 = vld [vmem:[%s1583_s1 + $0x80] ss:$16 sps:$4 sm:$0xff] (!%p190_p9)  }
  0x14   : > { %440 = vmatpush1.bf16.msra.mxu0 (!%p190_p9), %v1118_v7  ;;  %481 = vmatpush1.bf16.msra.mxu1 (!%p190_p9), %v1119_v8  ;;  %v1137_v20 = vld [vmem:[%s1583_s1 + $0x88] ss:$16 sps:$4 sm:$0xff] (!%p190_p9)   ;;  %v1138_v21 = vld [vmem:[%s1583_s1 + $0xa4] ss:$16 sps:$4 sm:$0xff] (!%p190_p9)   ;;  %v1140_v22 = vld [vmem:[%s1583_s1 + $0xac] ss:$16 sps:$4 sm:$0xff] (!%p190_p9)  }
  0x15   : > { %441 = vmatprep.subr.bf16.mxu0 %v1120_v9  ;;  %482 = vmatprep.subr.bf16.mxu1 %v1122_v10  ;;  %s217_s15 = scalar_select %p216_p10, %s1305_s22, 1  ;;  %v1142_v23 = vld [vmem:[%s1583_s1 + $0xa0] ss:$16 sps:$4 sm:$0xff]   ;;  %v1143_v24 = vld [vmem:[%s1583_s1 + $0xa8] ss:$16 sps:$4 sm:$0xff]   ;;  %v258_v4 = vshrl.u32 %v257_v3, 7 }
  0x16   : > { %v1144_v25 = vld [vmem:[%s1583_s1 + $0xc4] ss:$16 sps:$4 sm:$0xff]   ;;  %v1146_v26 = vld [vmem:[%s1583_s1 + $0xcc] ss:$16 sps:$4 sm:$0xff]   ;;  %v1148_v27 = vld [vmem:[%s1583_s1 + $0xc0] ss:$16 sps:$4 sm:$0xff]  }
  0x17   : > { %s954_s6 = sshll.u32 %s217_s15, 3  ;;  %v1149_v28 = vld [vmem:[%s1583_s1 + $0xc8] ss:$16 sps:$4 sm:$0xff]   ;;  %v1150_v29 = vld [vmem:[%s1583_s1 + $0xe4] ss:$16 sps:$4 sm:$0xff]   ;;  %v259_v5 = vsub.s32 0, %v258_v4 }
  0x18   : > { %442 = vmatpush1.bf16.msra.mxu0 %v1124_v11  ;;  %483 = vmatpush1.bf16.msra.mxu1 %v1125_v12  ;;  %s219_s25 = scalar_lea.vmem %s1582_s0, %s954_s6  ;;  %v1152_v30 = vld [vmem:[%s1583_s1 + $0xec] ss:$16 sps:$4 sm:$0xff]   ;;  %v1154_v31 = vld [vmem:[%s1583_s1 + $0xe0] ss:$16 sps:$4 sm:$0xff]   ;;  %v1155_v32 = vld [vmem:[%s1583_s1 + $0xe8] ss:$16 sps:$4 sm:$0xff]  }
  0x19   : > { %443 = vmatprep.subr.bf16.mxu0 %v1126_v13  ;;  %484 = vmatprep.subr.bf16.mxu1 %v1128_v14  ;;  %v221_v33 = vld [vmem:[%s219_s25] sm:$0xff]  ;;  %v1160_v39 = vld [vmem:[%s1585_s3 + $0x48] sm:$0xff]   ;;  %v1164_v43 = vld [vmem:[%s1585_s3 + $0x50] sm:$0xff]   ;;  %v267_v6 = vsub.s32 2, %v258_v4  ;;  %v263_v8 = vsub.s32 1, %v258_v4  ;;  %v271_v9 = vsub.s32 3, %v258_v4 }
  0x1a   : > { %v1156_v34 = vld [vmem:[%s1585_s3 + $0x40] sm:$0xff]   ;;  %v222_v37 = vpack.c.bf16 %v221_v33, %v221_v33  ;;  %v1161_v40 = vld [vmem:[%s1585_s3 + $0xc8] sm:$0xff]   ;;  %v1165_v44 = vld [vmem:[%s1585_s3 + $0xd0] sm:$0xff]   ;;  %s213_s6 = sand.u32 1, %s1242_s19   ;;  %vm874_vm0 = vcmask 261120   ;;  %s1253_s22 = smov [#allocation2]  }
  0x1b   : > { %v1157_v35 = vld [vmem:[%s1585_s3 + $0xc0] sm:$0xff]   ;;  %v1162_v41 = vld [vmem:[%s1585_s3 + $0x8] sm:$0xff]   ;;  %v1166_v45 = vld [vmem:[%s1585_s3 + $0x10] sm:$0xff]   ;;  %s953_s13 = sshll.u32 %s213_s6, 3  ;;  %s877_s7 = scalar_lea.sflag [#allocation3], %s213_s6 }
  0x1c   : > { %444 = vmatpush1.bf16.msra.mxu0 %v1130_v15  ;;  %485 = vmatpush1.bf16.msra.mxu1 %v1131_v16  ;;  %v1158_v36 = vld [vmem:[%s1585_s3] sm:$0xff]   ;;  %v1163_v42 = vld [vmem:[%s1585_s3 + $0x88] sm:$0xff]   ;;  %v1167_v46 = vld [vmem:[%s1585_s3 + $0x90] sm:$0xff]   ;;  %s215_s17 = scalar_lea.vmem [#allocation2], %s953_s13  ;;  %s1192_s9 = sshll.u32 %s1253_s22, 4  ;;  %s1193_s9 = int_to_ptr.vmem [resolvable:$false] %s1192_s9 }
  0x1d   : > { %445 = vmatprep.subr.bf16.mxu0 %v1132_v17  ;;  %486 = vmatprep.subr.bf16.mxu1 %v1134_v18  ;;  %v1159_v38 = vld [vmem:[%s1585_s3 + $0x80] sm:$0xff]   ;;  %v1168_v47 = vld [vmem:[%s1585_s3 + $0x58] sm:$0xff]   ;;  %v1176_v55 = vld [vmem:[%s1585_s3 + $0x68] sm:$0xff]   ;;  %s890_s23 = sshll.u32 %s215_s17, 4  ;;  %s1194_s10 = scalar_lea.vmem %s1193_s9, 256  ;;  %s1542_s23 = int_to_ptr.vmem [resolvable:$true] %s890_s23 }
  0x1e   : > { %v1169_v48 = vld [vmem:[%s1585_s3 + $0xd8] sm:$0xff]   ;;  %v1172_v51 = vld [vmem:[%s1585_s3 + $0x60] sm:$0xff]   ;;  %v1177_v56 = vld [vmem:[%s1585_s3 + $0xe8] sm:$0xff]   ;;  %s1188_s8 = scalar_lea.vmem %s1542_s23, 128  ;;  %p1195_p0 = scmp.lt.s32.totalorder %s1542_s23, %s1193_s9 }
  0x1f   : > { %v1170_v49 = vld [vmem:[%s1585_s3 + $0x18] sm:$0xff]   ;;  %v1173_v52 = vld [vmem:[%s1585_s3 + $0xe0] sm:$0xff]   ;;  %v1178_v57 = vld [vmem:[%s1585_s3 + $0x28] sm:$0xff]   ;;  %p1189_p11 = scmp.ne.s32.totalorder %s1542_s23, %s1188_s8  ;;  %p1196_p1 = scmp.lt.s32.totalorder %s1194_s10, %s1188_s8 }
  0x20   : > { %446 = vmatpush1.bf16.msra.mxu0 %v1136_v19  ;;  %487 = vmatpush1.bf16.msra.mxu1 %v1137_v20  ;;  %v1171_v50 = vld [vmem:[%s1585_s3 + $0x98] sm:$0xff]   ;;  %v1174_v53 = vld [vmem:[%s1585_s3 + $0x20] sm:$0xff]   ;;  %v1179_v58 = vld [vmem:[%s1585_s3 + $0xa8] sm:$0xff]  }
  0x21   : > { %447 = vmatprep.subr.bf16.mxu0 %v1138_v21  ;;  %488 = vmatprep.subr.bf16.mxu1 %v1140_v22  ;;  %v1175_v54 = vld [vmem:[%s1585_s3 + $0xa0] sm:$0xff]   ;;  %v1180_v59 = vld [vmem:[%s1585_s3 + $0x70] sm:$0xff]   ;;  %v1184_v63 = vld [vmem:[%s1585_s3 + $0x78] sm:$0xff]   ;;  %p1190_p12 = pnand %p1189_p11, %p1322_p5  ;;  %p1197_p2 = por %p1196_p1, %p1195_p0 }
  0x22   : > { %v1181_v60 = vld [vmem:[%s1585_s3 + $0xf0] sm:$0xff]   ;;  %v1185_v0 = vld [vmem:[%s1585_s3 + $0xf8] sm:$0xff]   ;;  %v255_v7 = vld [vmem:[%s1584_s2] sm:$0xf] }
  0x23   : > { %v1182_v61 = vld [vmem:[%s1585_s3 + $0x30] sm:$0xff]   ;;  %v1186_v1 = vld [vmem:[%s1585_s3 + $0x38] sm:$0xff]   ;;  %v260_v10 = vrot.slane %v255_v7, %v259_v5  ;;  %v268_v11 = vrot.slane %v255_v7, %v267_v6  ;;  %v264_v12 = vrot.slane %v255_v7, %v263_v8  ;;  %v272_v13 = vrot.slane %v255_v7, %v271_v9  ;;  %p1191_p13 = pneg %p1190_p12 }
  0x24   : > { %448 = vmatpush1.bf16.msra.mxu0 %v1142_v23  ;;  %489 = vmatpush1.bf16.msra.mxu1 %v1143_v24  ;;  %v1183_v62 = vld [vmem:[%s1585_s3 + $0xb0] sm:$0xff]   ;;  %v1187_v2 = vld [vmem:[%s1585_s3 + $0xb8] sm:$0xff]  }
  0x25   : > { %449 = vmatprep.subr.bf16.mxu0 %v1144_v25  ;;  %490 = vmatprep.subr.bf16.mxu1 %v1146_v26  ;;  %p1198_p3 = pnand %p1197_p2, %p1191_p13 }
  0x28   : > { %450 = vmatpush1.bf16.msra.mxu0 %v1148_v27  ;;  %491 = vmatpush1.bf16.msra.mxu1 %v1149_v28 }
  0x29   : > { %451 = vmatprep.subr.bf16.mxu0 %v1150_v29  ;;  %492 = vmatprep.subr.bf16.mxu1 %v1152_v30 }
  0x2c   : > { %452 = vmatpush1.bf16.msra.mxu0 %v1154_v31  ;;  %493 = vmatpush1.bf16.msra.mxu1 %v1155_v32 }
  0x2d   : > { %1024 = vmatprep.subr.bf16.mxu0 %v1156_v34  ;;  %1046 = vmatprep.subr.bf16.mxu1 %v1157_v35 }
  0x2f   : > { %470 = vmatmul.mubr.bf16.vlgmr.msra.gmra.mrb[0].mxu0 %v222_v37  ;;  %511 = vmatmul.mubr.bf16.vlgmr.msra.gmra.mrb[0].mxu1 %v222_v37 }
  0x30   : > { %1025 = vmatpush3.bf16.msra.mxu0 %v1158_v36  ;;  %1047 = vmatpush3.bf16.msra.mxu1 %v1159_v38 }
  0x31   : > { %1026 = vmatprep.subr.bf16.mxu0 %v1160_v39  ;;  %1048 = vmatprep.subr.bf16.mxu1 %v1161_v40  ;;  %v987_v40 = vld [vmem:[%s1586_s4] ss:$0 sm:$0xff] }
  0x34   : > { %1027 = vmatpush3.bf16.msra.mxu0 %v1162_v41  ;;  %1049 = vmatpush3.bf16.msra.mxu1 %v1163_v42 }
  0x35   : > { %1028 = vmatprep.subr.bf16.mxu0 %v1164_v43  ;;  %1050 = vmatprep.subr.bf16.mxu1 %v1165_v44 }
  0x38   : > { %1029 = vmatpush3.bf16.msra.mxu0 %v1166_v45  ;;  %1051 = vmatpush3.bf16.msra.mxu1 %v1167_v46 }
  0x39   : > { %1030 = vmatprep.subr.bf16.mxu0 %v1168_v47  ;;  %1052 = vmatprep.subr.bf16.mxu1 %v1169_v48 }
  0x3c   : > { %1031 = vmatpush3.bf16.msra.mxu0 %v1170_v49  ;;  %1053 = vmatpush3.bf16.msra.mxu1 %v1171_v50 }
  0x3d   : > { %1032 = vmatprep.subr.bf16.mxu0 %v1172_v51  ;;  %1054 = vmatprep.subr.bf16.mxu1 %v1173_v52 }
  0x40   : > { %1033 = vmatpush3.bf16.msra.mxu0 %v1174_v53  ;;  %1055 = vmatpush3.bf16.msra.mxu1 %v1175_v54 }
  0x41   : > { %1034 = vmatprep.subr.bf16.mxu0 %v1176_v55  ;;  %1056 = vmatprep.subr.bf16.mxu1 %v1177_v56 }
  0x44   : > { %1035 = vmatpush3.bf16.msra.mxu0 %v1178_v57  ;;  %1057 = vmatpush3.bf16.msra.mxu1 %v1179_v58 }
  0x45   : > { %1036 = vmatprep.subr.bf16.mxu0 %v1180_v59  ;;  %1058 = vmatprep.subr.bf16.mxu1 %v1181_v60 }
  0x48   : > { %1037 = vmatpush3.bf16.msra.mxu0 %v1182_v61  ;;  %1059 = vmatpush3.bf16.msra.mxu1 %v1183_v62 }
  0x49   : > { %1038 = vmatprep.subr.bf16.mxu0 %v1184_v63  ;;  %1060 = vmatprep.subr.bf16.mxu1 %v1185_v0 }
  0x4c   : > { %1039 = vmatpush3.bf16.msra.mxu0 %v1186_v1  ;;  %1061 = vmatpush3.bf16.msra.mxu1 %v1187_v2 }
 0x102   : > { %v471_v14 = vpop.f32.mrb[0].mxu0  ;;  %v512_v15 = vpop.f32.mrb[0].mxu1 }
 0x103   : > { %v472_v16 = vadd.f32 %v471_v14, %v260_v10  ;;  %v513_v17 = vadd.f32 %v512_v15, %v268_v11  ;;  %v473_v18 = vpop.f32.mrb[1].mxu0  ;;  %v514_v19 = vpop.f32.mrb[1].mxu1 }
 0x104   : > { %v474_v20 = vadd.f32 %v473_v18, %v264_v12  ;;  %v515_v21 = vadd.f32 %v514_v19, %v272_v13  ;;  %v475_v22 = vpop.f32.mrb[2].mxu0  ;;  %v516_v23 = vpop.f32.mrb[2].mxu1 }
 0x105   : > { %v519_v24 = vmul.f32 0.2, %v472_v16  ;;  %v521_v25 = vmul.f32 0.2, %v513_v17  ;;  %v476_v26 = vpop.f32.mrb[3].mxu0  ;;  %v517_v27 = vpop.f32.mrb[3].mxu1 }
 0x106   : > { %v520_v28 = vmul.f32 0.2, %v474_v20  ;;  %v522_v29 = vmul.f32 0.2, %v515_v21 }
 0x107   : > { %v523_v30 = vmax.f32 %v472_v16, %v519_v24  ;;  %v525_v31 = vmax.f32 %v513_v17, %v521_v25 }
 0x108   : > { %v524_v32 = vmax.f32 %v474_v20, %v520_v28  ;;  %v526_v33 = vmax.f32 %v515_v21, %v522_v29 }
 0x109   : > { %v527_v36 = vpack.c.bf16 %v523_v30, %v523_v30  ;;  %v529_v37 = vpack.c.bf16 %v525_v31, %v525_v31 }
 0x10a   : > { %v528_v34 = vpack.c.bf16 %v524_v32, %v524_v32  ;;  %v530_v35 = vpack.c.bf16 %v526_v33, %v526_v33 }
 0x10c   : > { %826 = vmatprep.mubr.bf16.mxu0 %v528_v34  ;;  %866 = vmatprep.mubr.bf16.mxu1 %v530_v35 }
 0x10d   : > { %827 = vmatmul.mubr.bf16.vlgmr.msra.gmra.mrb[4].mxu0 %v527_v36  ;;  %867 = vmatmul.mubr.bf16.vlgmr.msra.gmra.mrb[4].mxu1 %v529_v37 }
 0x1e0   : > { %v1040_v38 = vpop.f32.mrb[4].mxu0  ;;  %v1062_v39 = vpop.f32.mrb[4].mxu1 }
 0x1e1   : > { %v1041_v41 = vpop.f32.mrb[5].mxu0  ;;  %v1063_v42 = vpop.f32.mrb[5].mxu1 }
 0x1e2   : > { %v1042_v43 = vadd.f32 %v1041_v41, %v1040_v38  ;;  %v1064_v44 = vadd.f32 %v1063_v42, %v1062_v39  ;;  %v1043_v45 = vpop.f32.mrb[6].mxu0  ;;  %v1065_v46 = vpop.f32.mrb[6].mxu1 }
 0x1e3   : > { %v1044_v47 = vpop.f32.mrb[7].mxu0  ;;  %v1066_v48 = vpop.f32.mrb[7].mxu1 }
 0x1e4   : > { %v829_v49 = vadd.f32 %v1042_v43, %v987_v40 }
 0x1e6   : > { %v869_v50 = vadd.f32 %v1064_v44, %v829_v49 }
 0x1e8   : > { %875 = vst.msk [vmem:[%s215_s17] sm:$0xff] %vm874_vm0, %v869_v50 }
 0x1e9   : > { %1201 = shalt.err (!%p1198_p3)
}
 0x1ea   : > { %s1202_s11 = scalar_lea.hbm %s1540_s30, 128  ;;  %s1206_s13 = scalar_lea.hbm %s1587_s5, 256 }
 0x1eb   : > { %p1203_p4 = scmp.ne.s32.totalorder %s1540_s30, %s1202_s11  ;;  %p1207_p9 = scmp.lt.u32.totalorder %s1540_s30, %s1587_s5 }
 0x1ec   : > { %p1208_p10 = scmp.lt.u32.totalorder %s1206_s13, %s1202_s11  ;;  %p1210_p12 = scmp.lt.u32.totalorder %s1202_s11, %s1540_s30 }
 0x1ed   : > { %p1204_p7 = pnand %p1203_p4, %p1322_p5 }
 0x1ee   : > { %p1209_p11 = por %p1208_p10, %p1207_p9 }
 0x1ef   : > { %p1205_p8 = pneg %p1204_p7 }
 0x1f0   : > { %p1211_p13 = por %p1210_p12, %p1209_p11 }
 0x1f2   : > { %p1212_p0 = pnand %p1211_p13, %p1205_p8 }
 0x1f4   : > { %1215 = shalt.err (!%p1212_p0)
}
 0x1f5   : > { %1068 = dma.vmem_to_hbm [thread:$0]  (%p1322_p5), %s1542_s23, 128, %s1540_s30, %s877_s7  }
 0x1f6 PF: > { %p1074_p1 = scmp.ge.s32.totalorder %s1250_s21, 2  ;;  %s902_s16 = sand.u32 1, %s1238_s18  }
 0x1f7   : > { %s903_s17 = scalar_lea.sflag [#allocation3], %s902_s16 }
 0x1f8   : > { %p1071_p2 = pnand %p1074_p1, %p1326_p6 }
 0x1fa   : > { %1233 = dma.done.wait (!%p1071_p2), %s903_s17, 128  }
 0x1fb   : > { %1235 = vsyncadd (!%p1071_p2), %s903_s17, 4294967168  ;;  %p15_p3 = scmp.ge.s32.totalorder %s1309_s24, 4   ;;  %s1590_s18 = smov %s1242_s19 }
 0x1fc   : > { %s1591_s19 = smov %s1246_s20  ;;  %s1592_s20 = smov %s1320_s27 }
 0x1fd   : > { %s1593_s21 = smov %s1309_s24  ;;  %17 = sbr.rel (!%p15_p3) target bundleno = 3 (0x3), region = 75 }
 0x204   :  { %908 = vsyncpa [#allocation3], 1 }
 0x205   :  { %910 = vsyncpa [#allocation3 + $0x1], 1 }

</bundles_post_ra>
